<compile_context>
chip_gen: v7x
topology: tpu7x:2x2x1
jax: 0.10.0
libtpu: 0.0.40
codegen_flags: <defaults>
</compile_context>

<pallas_src>
import math
from functools import partial

import numpy as np
import jax
import jax.numpy as jnp
from jax.experimental import pallas as pl
from jax.experimental.pallas import tpu as pltpu

# ----------------------------------------------------------------------------
# Synthetic architecture config (replaces ResNet20_Channel_Prune.prune_ratio)
# ----------------------------------------------------------------------------
PRUNE_RATIO = [[7, 5, 3, 1]]   # prune_ratio[index_p][j] indexes choose_channels


def _choose_channels(planes):
    if planes == 16:
        return list(range(2, 17, 2))
    elif planes == 32:
        return list(range(2, 33, 2))
    return list(range(2, 65, 2))


def _channel_interp_matrix(in_c, out_c):
    """M (in_c, out_c) s.t. x @ M == adaptive avg-pool ('area' interpolate) of
    the channel dim from in_c to out_c."""
    M = np.zeros((in_c, out_c), dtype=np.float32)
    for i in range(out_c):
        start = (i * in_c) // out_c
        end = math.ceil((i + 1) * in_c / out_c)
        M[start:end, i] = 1.0 / (end - start)
    return M


def _combined_mixing_matrix(arch_weights, index_p, cfg, planes):
    """Single (planes, cfg) matrix implementing: slice [:, :oC_j] -> area
    interp to cfg -> weighted sum over the 4 branches (one contraction)."""
    choose = _choose_channels(planes)
    choices = [choose[PRUNE_RATIO[index_p][j]] for j in range(4)]
    mj = np.zeros((4, planes, cfg), dtype=np.float32)
    for j, oC in enumerate(choices):
        mj[j, :oC, :] = _channel_interp_matrix(oC, cfg)
    return jnp.einsum("j,jpc->pc", arch_weights[index_p], jnp.asarray(mj))


def _conv_lane_weights(w_hwio, W):
    """(3,3,Ci,Co) HWIO conv weights -> (W*Ci, 3*W*Co) lane-dense matrix.

    Column block ky holds the block-tridiagonal matrix M_ky with
      M_ky[w'*Ci+ci, w*Co+co] = w_hwio[ky, w'-w+1, ci, co]  for |w'-w| <= 1
                                0                            otherwise,
    so  x_row(h+ky-1) @ M_ky  is the ky-tap contribution of the 3x3 conv and
    the W boundary (padding=1) is handled entirely by the band structure.
    """
    Ci, Co = w_hwio.shape[2], w_hwio.shape[3]
    S = np.zeros((3, W, W), np.float32)          # S[kx, w', w] = [w' == w+kx-1]
    for kx in range(3):
        for w in range(W):
            wp = w + kx - 1
            if 0 <= wp < W:
                S[kx, wp, w] = 1.0
    band = jnp.einsum("xpw,yxio->piywo", jnp.asarray(S), w_hwio)
    return band.reshape(W * Ci, 3 * W * Co)      # rows=(w',ci)  cols=(ky,w,co)


# ----------------------------------------------------------------------------
# Fused Pallas kernel: conv1+BN1+ReLU -> conv2+BN2+mix -> +residual -> ReLU
# ----------------------------------------------------------------------------
def _fused_block_kernel(x_ref, w1_ref, b1_ref, w2_ref, b2_ref, o_ref,
                        *, bn, H, LC_in, LC_mid, LC_out):
    # x_ref:  (bn, H, LC_in)        bf16   lane-dense input (also the residual)
    # w1_ref: (LC_in, 3*LC_mid)     bf16   conv1 band weights (BN1 scale folded)
    # b1_ref: (1, LC_mid)           f32
    # w2_ref: (LC_mid, 3*LC_out)    bf16   conv2 band weights (BN2 + mixing folded)
    # b2_ref: (1, LC_out)           f32
    # o_ref:  (bn, H, LC_out)       f32
    M = bn * H

    def conv3x3(inp_flat, w_ref, LC_o):
        # One MXU matmul emits the three ky taps side by side on the lane dim;
        # the kx taps / W boundary are already folded into the band matrix.
        p = jnp.dot(inp_flat, w_ref[...], preferred_element_type=jnp.float32)
        p = p.reshape(bn, H, 3 * LC_o)
        p0 = p[:, :, 0 * LC_o:1 * LC_o]          # tap ky=0: needs shift h -> h+1
        p1 = p[:, :, 1 * LC_o:2 * LC_o]          # tap ky=1
        p2 = p[:, :, 2 * LC_o:3 * LC_o]          # tap ky=2: needs shift h -> h-1
        zr = jnp.zeros((bn, 1, LC_o), jnp.float32)
        down = jnp.concatenate([zr, p0[:, :H - 1, :]], axis=1)   # zero top row
        up = jnp.concatenate([p2[:, 1:, :], zr], axis=1)         # zero bottom row
        return (p1 + down + up).reshape(M, LC_o)

    x = x_ref[...].reshape(M, LC_in)             # bf16, stays resident in vregs

    # conv1 (3x3, pad=1) + BN1 + ReLU  (f32 epilogue — v5e-safe, no bf16 VPU)
    y1 = jnp.maximum(conv3x3(x, w1_ref, LC_mid) + b1_ref[...], 0.0)

    # conv2 (3x3, pad=1) + BN2 + channel-slice/area-interp mixing (all folded)
    y2 = conv3x3(y1.astype(jnp.bfloat16), w2_ref, LC_out)

    # residual add (requires inplanes == cfg -> LC_in == LC_out) + final ReLU
    res = x.astype(jnp.float32)
    out = jnp.maximum(y2 + b2_ref[...] + res, 0.0)
    o_ref[...] = out.reshape(bn, H, LC_out)


# ----------------------------------------------------------------------------
# Generation-aware tiling
# ----------------------------------------------------------------------------
def _tpu_tuning():
    try:
        kind = jax.devices()[0].device_kind.lower()
    except Exception:
        kind = ""
    if "v5" in kind:                                    # v5e: 128x128 MXU
        return dict(target_rows=128, vmem_budget=12 << 20, min_grid=1)
    if "v6" in kind:                                    # v6e: 256-deep MXU
        return dict(target_rows=256, vmem_budget=24 << 20, min_grid=1)
    if "v7" in kind or "7x" in kind:                    # v7x: 2 TCs, 64 MiB VMEM
        return dict(target_rows=256, vmem_budget=24 << 20, min_grid=2)
    return dict(target_rows=256, vmem_budget=16 << 20, min_grid=2)


def _vmem_per_step(bn, H, W, Cin, C1, Cout):
    """Per-step VMEM estimate including in-kernel temporaries."""
    bf2, f4 = 2, 4
    lc_in, lc_mid, lc_out = W * Cin, W * C1, W * Cout
    x_blk = 2 * bn * H * lc_in * bf2                       # double-buffered input
    o_blk = 2 * bn * H * lc_out * f4                       # double-buffered output
    wts = 2 * (lc_in * 3 * lc_mid + lc_mid * 3 * lc_out) * bf2 \
        + 2 * (lc_mid + lc_out) * f4                       # resident weights/biases
    temps = bn * H * (5 * lc_mid + 5 * lc_out) * f4        # tap results / y1 / y2
    return int(1.5 * (x_blk + o_blk + wts + temps))


def _pick_batch_tile(N, H, W, Cin, C1, Cout, *, target_rows, vmem_budget, min_grid):
    """Largest divisor of N s.t. bn*H approaches the MXU row target while the
    per-step VMEM estimate fits the budget; capped so grid >= min_grid."""
    cap = max(1, N // min_grid)
    best = 1
    for bn in range(1, cap + 1):
        if N % bn:
            continue
        if _vmem_per_step(bn, H, W, Cin, C1, Cout) > vmem_budget:
            break
        best = bn
        if bn * H >= target_rows:
            break
    return best


def fused_basic_block(x_lane, w1_cat, b1_lane, w2_cat, b2_lane,
                      *, H, W, Cin, C1, Cout):
    N = x_lane.shape[0]
    LC_in, LC_mid, LC_out = W * Cin, W * C1, W * Cout
    tune = _tpu_tuning()
    bn = _pick_batch_tile(N, H, W, Cin, C1, Cout, **tune)
    kernel = partial(_fused_block_kernel, bn=bn, H=H,
                     LC_in=LC_in, LC_mid=LC_mid, LC_out=LC_out)
    return pl.pallas_call(
        kernel,
        out_shape=jax.ShapeDtypeStruct((N, H, LC_out), jnp.float32),
        grid=(N // bn,),
        in_specs=[
            pl.BlockSpec((bn, H, LC_in), lambda i: (i, 0, 0)),
            pl.BlockSpec((LC_in, 3 * LC_mid), lambda i: (0, 0)),   # resident
            pl.BlockSpec((1, LC_mid), lambda i: (0, 0)),
            pl.BlockSpec((LC_mid, 3 * LC_out), lambda i: (0, 0)),  # resident
            pl.BlockSpec((1, LC_out), lambda i: (0, 0)),
        ],
        out_specs=pl.BlockSpec((bn, H, LC_out), lambda i: (i, 0, 0)),
        compiler_params=pltpu.CompilerParams(
            dimension_semantics=("parallel",),     # megacore-shardable batch axis
            vmem_limit_bytes=32 << 20),
    )(x_lane, w1_cat, b1_lane, w2_cat, b2_lane)


# ----------------------------------------------------------------------------
# BasicBlock forward (wrapper: layout + trace-time folding)
# ----------------------------------------------------------------------------
def basic_block_forward(x_nchw, params, arch_weights, *, index_p, cfg, planes):
    """x_nchw: (N, inplanes, H, W).  BN applied in eval mode (folded)."""
    N, Cin, H, W = x_nchw.shape
    assert Cin == cfg, "residual add requires inplanes == cfg (downsample=None)"

    # Lane-dense layout: rows=(n,h), lanes=(w,c); bf16 halves input DMA/VMEM.
    x_lane = jnp.transpose(x_nchw, (0, 2, 3, 1)).reshape(N, H, W * Cin)
    x_lane = x_lane.astype(jnp.bfloat16)

    # conv1 weights: fold BN1 scale, build the lane-dense band matrix, bf16.
    w1 = params["w1_hwio"] * params["bn1_scale"]                  # (3,3,Cin,cfg)
    w1_cat = _conv_lane_weights(w1, W).astype(jnp.bfloat16)       # (W*Cin, 3*W*cfg)
    b1_lane = jnp.tile(params["bn1_bias"], W).reshape(1, W * cfg).astype(jnp.float32)

    # Combined channel-slice + area-interp + arch-weight mixing matrix.
    m_comb = _combined_mixing_matrix(arch_weights, index_p, cfg, planes)

    # conv2 weights: fold BN2 scale AND the mixing matrix, then band + bf16;
    # BN2 bias is pushed through the mixing matrix.
    w2 = jnp.einsum("hwic,c,cm->hwim",
                    params["w2_hwio"], params["bn2_scale"], m_comb)
    w2_cat = _conv_lane_weights(w2, W).astype(jnp.bfloat16)       # (W*cfg, 3*W*cfg)
    b2_lane = jnp.tile(params["bn2_bias"] @ m_comb, W).reshape(1, W * cfg)
    b2_lane = b2_lane.astype(jnp.float32)

    out_lane = fused_basic_block(x_lane, w1_cat, b1_lane, w2_cat, b2_lane,
                                 H=H, W=W, Cin=Cin, C1=cfg, Cout=cfg)
    return jnp.transpose(out_lane.reshape(N, H, W, cfg), (0, 3, 1, 2))  # NCHW


# ----------------------------------------------------------------------------
# Pure-JAX reference (f32) for correctness checking
# ----------------------------------------------------------------------------
def reference_forward(x_nchw, params, arch_weights, *, index_p, cfg, planes):
    x = x_nchw.astype(jnp.float32)

    def conv(inp, w_hwio):
        return jax.lax.conv_general_dilated(
            inp, w_hwio, window_strides=(1, 1), padding="SAME",
            dimension_numbers=("NCHW", "HWIO", "NCHW"))

    y = conv(x, params["w1_hwio"])
    y = y * params["bn1_scale"][None, :, None, None] \
        + params["bn1_bias"][None, :, None, None]
    y = jnp.maximum(y, 0.0)
    y = conv(y, params["w2_hwio"])
    y = y * params["bn2_scale"][None, :, None, None] \
        + params["bn2_bias"][None, :, None, None]
    m = _combined_mixing_matrix(arch_weights, index_p, cfg, planes)
    mixed = jnp.einsum("nphw,pc->nchw", y, m)
    return jnp.maximum(mixed + x, 0.0)


# ----------------------------------------------------------------------------
# Deterministic parameter construction
# ----------------------------------------------------------------------------
def make_params(key, inplanes, cfg, planes, eps=1e-5):
    ks = jax.random.split(key, 10)
    w1 = jax.random.normal(ks[0], (cfg, inplanes, 3, 3), jnp.float32) * 0.1
    w2 = jax.random.normal(ks[1], (planes, cfg, 3, 3), jnp.float32) * 0.1

    def bn(kg, kb, km, kv, C):
        gamma = 1.0 + 0.1 * jax.random.normal(kg, (C,), jnp.float32)
        beta = 0.1 * jax.random.normal(kb, (C,), jnp.float32)
        mean = 0.1 * jax.random.normal(km, (C,), jnp.float32)
        var = 0.5 + jnp.abs(jax.random.normal(kv, (C,), jnp.float32))
        scale = gamma / jnp.sqrt(var + eps)
        bias = beta - mean * scale
        return scale, bias

    bn1_scale, bn1_bias = bn(ks[2], ks[3], ks[4], ks[5], cfg)
    bn2_scale, bn2_bias = bn(ks[6], ks[7], ks[8], ks[9], planes)

    return {
        # OIHW -> HWIO
        "w1_hwio": jnp.transpose(w1, (2, 3, 1, 0)),
        "w2_hwio": jnp.transpose(w2, (2, 3, 1, 0)),
        "bn1_scale": bn1_scale, "bn1_bias": bn1_bias,
        "bn2_scale": bn2_scale, "bn2_bias": bn2_bias,
    }


if __name__ == "__main__":
    # Small shapes consistent with the module; W*C = 8*16 = 128 -> lane-dense.
    N, inplanes, cfg, planes, H, W = 2, 16, 16, 16, 8, 8
    index_p = 0

    key = jax.random.PRNGKey(0)
    k_x, k_p, k_w = jax.random.split(key, 3)

    x = jax.random.normal(k_x, (N, inplanes, H, W), jnp.float32)
    params = make_params(k_p, inplanes, cfg, planes)
    # architecture mixing weights: weights[index_p][0..3], softmax-normalized
    arch_weights = jax.nn.softmax(
        jax.random.normal(k_w, (len(PRUNE_RATIO), 4), jnp.float32), axis=-1)

    fwd = jax.jit(partial(basic_block_forward,
                          index_p=index_p, cfg=cfg, planes=planes))
    out = jax.block_until_ready(fwd(x, params, arch_weights))

    assert out.shape == (N, cfg, H, W)
    assert bool(jnp.all(jnp.isfinite(out)))

    ref = reference_forward(x, params, arch_weights,
                            index_p=index_p, cfg=cfg, planes=planes)
    out_np, ref_np = np.asarray(out), np.asarray(ref)
    # bf16 MXU operands (and bf16 input) vs f32 reference:
    # tight aggregate check + loose per-element check.
    rel_fro = np.linalg.norm(out_np - ref_np) / max(np.linalg.norm(ref_np), 1e-6)
    assert rel_fro < 5e-2, f"relative Frobenius error too large: {rel_fro}"
    np.testing.assert_allclose(out_np, ref_np, rtol=1e-1, atol=1e-1)
    print("KERNEL_OK")
</pallas_src>

<mosaic_0001>
module attributes {stable_mosaic.version = 11 : i64} {
  func.func @_fused_block_kernel(%arg0: i32, %arg1: memref<1x8x128xbf16, #tpu.memory_space<vmem>>, %arg2: memref<128x384xbf16, #tpu.memory_space<vmem>>, %arg3: memref<1x128xf32, #tpu.memory_space<vmem>>, %arg4: memref<128x384xbf16, #tpu.memory_space<vmem>>, %arg5: memref<1x128xf32, #tpu.memory_space<vmem>>, %arg6: memref<1x8x128xf32, #tpu.memory_space<vmem>>) attributes {dimension_semantics = [#tpu.dimension_semantics<parallel>], iteration_bounds = array<i64: 2>, scalar_prefetch = 0 : i64, scratch_operands = 0 : i64, tpu.core_type = #tpu.core_type<tc>, window_params = [{transform_indices = @transform_0, window_bounds = array<i64: 1, 8, 128>}, {pipeline_mode = #tpu.pipeline_mode<synchronous>, transform_indices = @transform_1, window_bounds = array<i64: 128, 384>}, {pipeline_mode = #tpu.pipeline_mode<synchronous>, transform_indices = @transform_2, window_bounds = array<i64: 1, 128>}, {pipeline_mode = #tpu.pipeline_mode<synchronous>, transform_indices = @transform_3, window_bounds = array<i64: 128, 384>}, {pipeline_mode = #tpu.pipeline_mode<synchronous>, transform_indices = @transform_4, window_bounds = array<i64: 1, 128>}, {transform_indices = @transform_5, window_bounds = array<i64: 1, 8, 128>}]} {
    %c0 = arith.constant 0 : index
    %c0_0 = arith.constant 0 : index
    %c0_1 = arith.constant 0 : index
    %0 = vector.load %arg1[%c0, %c0_0, %c0_1] : memref<1x8x128xbf16, #tpu.memory_space<vmem>>, vector<1x8x128xbf16>
    %1 = vector.shape_cast %0 : vector<1x8x128xbf16> to vector<8x128xbf16>
    %c0_2 = arith.constant 0 : index
    %c0_3 = arith.constant 0 : index
    %2 = vector.load %arg2[%c0_2, %c0_3] : memref<128x384xbf16, #tpu.memory_space<vmem>>, vector<128x384xbf16>
    %cst = arith.constant dense<0.000000e+00> : vector<8x384xf32>
    %3 = tpu.matmul %1, %2, %cst {dimension_numbers = #tpu.dot_dimension_numbers<[1], [0], [0], [1], [0, 0, 1, 1], [], []>} : vector<8x128xbf16>, vector<128x384xbf16>, vector<8x384xf32> -> vector<8x384xf32>
    %4 = vector.shape_cast %3 : vector<8x384xf32> to vector<1x8x384xf32>
    %5 = vector.extract_strided_slice %4 {offsets = [0, 0, 0], sizes = [1, 8, 128], strides = [1, 1, 1]} : vector<1x8x384xf32> to vector<1x8x128xf32>
    %6 = vector.extract_strided_slice %4 {offsets = [0, 0, 128], sizes = [1, 8, 128], strides = [1, 1, 1]} : vector<1x8x384xf32> to vector<1x8x128xf32>
    %7 = vector.extract_strided_slice %4 {offsets = [0, 0, 256], sizes = [1, 8, 128], strides = [1, 1, 1]} : vector<1x8x384xf32> to vector<1x8x128xf32>
    %cst_4 = arith.constant 0.000000e+00 : f32
    %8 = vector.broadcast %cst_4 : f32 to vector<1x1x128xf32>
    %9 = vector.extract_strided_slice %5 {offsets = [0, 0, 0], sizes = [1, 7, 128], strides = [1, 1, 1]} : vector<1x8x128xf32> to vector<1x7x128xf32>
    %10 = tpu.concatenate %8, %9 in 1 : vector<1x1x128xf32>, vector<1x7x128xf32> -> vector<1x8x128xf32>
    %11 = vector.extract_strided_slice %7 {offsets = [0, 1, 0], sizes = [1, 7, 128], strides = [1, 1, 1]} : vector<1x8x128xf32> to vector<1x7x128xf32>
    %12 = tpu.concatenate %11, %8 in 1 : vector<1x7x128xf32>, vector<1x1x128xf32> -> vector<1x8x128xf32>
    %13 = arith.addf %6, %10 : vector<1x8x128xf32>
    %14 = arith.addf %13, %12 : vector<1x8x128xf32>
    %15 = vector.shape_cast %14 : vector<1x8x128xf32> to vector<8x128xf32>
    %c0_5 = arith.constant 0 : index
    %c0_6 = arith.constant 0 : index
    %16 = vector.load %arg3[%c0_5, %c0_6] : memref<1x128xf32, #tpu.memory_space<vmem>>, vector<1x128xf32>
    %17 = vector.broadcast %16 : vector<1x128xf32> to vector<8x128xf32>
    %18 = arith.addf %15, %17 : vector<8x128xf32>
    %cst_7 = arith.constant 0.000000e+00 : f32
    %19 = vector.broadcast %cst_7 : f32 to vector<8x128xf32>
    %20 = arith.maximumf %18, %19 : vector<8x128xf32>
    %21 = arith.truncf %20 : vector<8x128xf32> to vector<8x128xbf16>
    %c0_8 = arith.constant 0 : index
    %c0_9 = arith.constant 0 : index
    %22 = vector.load %arg4[%c0_8, %c0_9] : memref<128x384xbf16, #tpu.memory_space<vmem>>, vector<128x384xbf16>
    %cst_10 = arith.constant dense<0.000000e+00> : vector<8x384xf32>
    %23 = tpu.matmul %21, %22, %cst_10 {dimension_numbers = #tpu.dot_dimension_numbers<[1], [0], [0], [1], [0, 0, 1, 1], [], []>} : vector<8x128xbf16>, vector<128x384xbf16>, vector<8x384xf32> -> vector<8x384xf32>
    %24 = vector.shape_cast %23 : vector<8x384xf32> to vector<1x8x384xf32>
    %25 = vector.extract_strided_slice %24 {offsets = [0, 0, 0], sizes = [1, 8, 128], strides = [1, 1, 1]} : vector<1x8x384xf32> to vector<1x8x128xf32>
    %26 = vector.extract_strided_slice %24 {offsets = [0, 0, 128], sizes = [1, 8, 128], strides = [1, 1, 1]} : vector<1x8x384xf32> to vector<1x8x128xf32>
    %27 = vector.extract_strided_slice %24 {offsets = [0, 0, 256], sizes = [1, 8, 128], strides = [1, 1, 1]} : vector<1x8x384xf32> to vector<1x8x128xf32>
    %cst_11 = arith.constant 0.000000e+00 : f32
    %28 = vector.broadcast %cst_11 : f32 to vector<1x1x128xf32>
    %29 = vector.extract_strided_slice %25 {offsets = [0, 0, 0], sizes = [1, 7, 128], strides = [1, 1, 1]} : vector<1x8x128xf32> to vector<1x7x128xf32>
    %30 = tpu.concatenate %28, %29 in 1 : vector<1x1x128xf32>, vector<1x7x128xf32> -> vector<1x8x128xf32>
    %31 = vector.extract_strided_slice %27 {offsets = [0, 1, 0], sizes = [1, 7, 128], strides = [1, 1, 1]} : vector<1x8x128xf32> to vector<1x7x128xf32>
    %32 = tpu.concatenate %31, %28 in 1 : vector<1x7x128xf32>, vector<1x1x128xf32> -> vector<1x8x128xf32>
    %33 = arith.addf %26, %30 : vector<1x8x128xf32>
    %34 = arith.addf %33, %32 : vector<1x8x128xf32>
    %35 = vector.shape_cast %34 : vector<1x8x128xf32> to vector<8x128xf32>
    %36 = arith.extf %1 : vector<8x128xbf16> to vector<8x128xf32>
    %c0_12 = arith.constant 0 : index
    %c0_13 = arith.constant 0 : index
    %37 = vector.load %arg5[%c0_12, %c0_13] : memref<1x128xf32, #tpu.memory_space<vmem>>, vector<1x128xf32>
    %38 = vector.broadcast %37 : vector<1x128xf32> to vector<8x128xf32>
    %39 = arith.addf %35, %38 : vector<8x128xf32>
    %40 = arith.addf %39, %36 : vector<8x128xf32>
    %cst_14 = arith.constant 0.000000e+00 : f32
    %41 = vector.broadcast %cst_14 : f32 to vector<8x128xf32>
    %42 = arith.maximumf %40, %41 : vector<8x128xf32>
    %43 = vector.shape_cast %42 : vector<8x128xf32> to vector<1x8x128xf32>
    %c0_15 = arith.constant 0 : index
    %c0_16 = arith.constant 0 : index
    %c0_17 = arith.constant 0 : index
    %44 = vector.load %arg6[%c0_15, %c0_16, %c0_17] : memref<1x8x128xf32, #tpu.memory_space<vmem>>, vector<1x8x128xf32>
    tpu.vector_store %arg6[%c0_15, %c0_16, %c0_17], %43 {strides = array<i32>} : memref<1x8x128xf32, #tpu.memory_space<vmem>>, vector<1x8x128xf32>,
    return
  }
  func.func @transform_0(%arg0: i32) -> (i32, i32, i32) {
    %c0_i32 = arith.constant 0 : i32
    %c0_i32_0 = arith.constant 0 : i32
    %c0_i32_1 = arith.constant 0 : i32
    return %arg0, %c0_i32, %c0_i32_0 : i32, i32, i32
  }
  func.func @transform_1(%arg0: i32) -> (i32, i32) {
    %c0_i32 = arith.constant 0 : i32
    %c0_i32_0 = arith.constant 0 : i32
    %c0_i32_1 = arith.constant 0 : i32
    return %c0_i32, %c0_i32_0 : i32, i32
  }
  func.func @transform_2(%arg0: i32) -> (i32, i32) {
    %c0_i32 = arith.constant 0 : i32
    %c0_i32_0 = arith.constant 0 : i32
    %c0_i32_1 = arith.constant 0 : i32
    return %c0_i32, %c0_i32_0 : i32, i32
  }
  func.func @transform_3(%arg0: i32) -> (i32, i32) {
    %c0_i32 = arith.constant 0 : i32
    %c0_i32_0 = arith.constant 0 : i32
    %c0_i32_1 = arith.constant 0 : i32
    return %c0_i32, %c0_i32_0 : i32, i32
  }
  func.func @transform_4(%arg0: i32) -> (i32, i32) {
    %c0_i32 = arith.constant 0 : i32
    %c0_i32_0 = arith.constant 0 : i32
    %c0_i32_1 = arith.constant 0 : i32
    return %c0_i32, %c0_i32_0 : i32, i32
  }
  func.func @transform_5(%arg0: i32) -> (i32, i32, i32) {
    %c0_i32 = arith.constant 0 : i32
    %c0_i32_0 = arith.constant 0 : i32
    %c0_i32_1 = arith.constant 0 : i32
    return %arg0, %c0_i32, %c0_i32_0 : i32, i32, i32
  }
}

</mosaic_0001>

<bundles_post_ra>
// kernel: tile.18
= control target key start
LH: loop header
LB: loop body
LE: loop exit
PB: predicated region body
PF: predicated region fallthrough
CT: control target
= control target key end

     0   :  { %s22_s0 = inlined_call_operand.vmem [shape: f32[16], index: 0, kind: input, shape index: {}]   ;;  %s23_s1 = inlined_call_operand.vmem [shape: f32[8,16], index: 1, kind: output, shape index: {}]  }
   0x1   :  { %v4_v0 = vld [vmem:[%s22_s0] ss:$0 sm:$0xff] }
   0x2   :  { %5 = vst [vmem:[%s23_s1] sm:$0xff] %v4_v0 }

// kernel: tile.19
= control target key start
LH: loop header
LB: loop body
LE: loop exit
PB: predicated region body
PF: predicated region fallthrough
CT: control target
= control target key end

     0   :  { %s67_s10 = smov 112   ;;  %s68_s11 = smov 80   ;;  %vm3_vm0 = vcmask 130048   ;;  %vm9_vm1 = vcmask 1048448   ;;  %vm15_vm2 = vcmask 917248   ;;  %vm21_vm3 = vcmask 786048   ;;  %s111_s0 = inlined_call_operand.vmem [shape: f32[8,16], index: 0, kind: input, shape index: {}]   ;;  %s112_s1 = inlined_call_operand.vmem [shape: f32[1,128], index: 1, kind: output, shape index: {}]  }
   0x1   :  { %v53_v0 = vld [vmem:[%s111_s0 + $0x7] sm:$0x1]   ;;  %v55_v1 = vld [vmem:[%s111_s0 + $0x5] sm:$0x1]   ;;  %v54_v2 = vld [vmem:[%s111_s0 + $0x6] sm:$0x1]  }
   0x2   :  { %7 = vrot.lane.b32.xlu0 %v53_v0, %s67_s10  ;;  %19 = vrot.lane.b32.xlu1 %v55_v1, %s68_s11  ;;  %v56_v3 = vld [vmem:[%s111_s0 + $0x4] sm:$0x1]   ;;  %v2_v4 = vld [vmem:[%s111_s0] sm:$0x1]   ;;  %s69_s18 = smov 96   ;;  %s70_s19 = smov 64  }
   0x3   :  { %4 = vst.msk [vmem:[#allocation0] sm:$0x1] %vm3_vm0, %v2_v4   ;;  %v57_v5 = vld [vmem:[%s111_s0 + $0x3] sm:$0x1]   ;;  %v58_v6 = vld [vmem:[%s111_s0 + $0x2] sm:$0x1]  }
   0x4   :  { %s71_s24 = smov 48   ;;  %s72_s25 = smov 32   ;;  %v59_v7 = vld [vmem:[%s111_s0 + $0x1] sm:$0x1]   ;;  %vm27_vm4 = vcmask 654848   ;;  %vm33_vm5 = vcmask 523648  }
   0x5   :  { %s73_s0 = smov 16   ;;  %vm39_vm6 = vcmask 392448   ;;  %vm45_vm7 = vcmask 261248  }
   0x6   :  { %13 = vrot.lane.b32.xlu0 %v54_v2, %s69_s18  ;;  %25 = vrot.lane.b32.xlu1 %v56_v3, %s70_s19 }
   0xa   :  { %31 = vrot.lane.b32.xlu0 %v57_v5, %s71_s24  ;;  %37 = vrot.lane.b32.xlu1 %v58_v6, %s72_s25 }
   0xe   :  { %43 = vrot.lane.b32.xlu0 %v59_v7, %s73_s0 }
  0x74   :  { %v8_v8 = vpop.permute.xlu0 %7   ;;  %v20_v9 = vpop.permute.xlu1 %19  }
  0x75   :  { %10 = vst.msk [vmem:[#allocation0] sm:$0x1] %vm9_vm1, %v8_v8  }
  0x78   :  { %v14_v10 = vpop.permute.xlu0 %13   ;;  %v26_v11 = vpop.permute.xlu1 %25  }
  0x79   :  { %16 = vst.msk [vmem:[#allocation0] sm:$0x1] %vm15_vm2, %v14_v10  }
  0x7a   :  { %22 = vst.msk [vmem:[#allocation0] sm:$0x1] %vm21_vm3, %v20_v9  }
  0x7b   :  { %28 = vst.msk [vmem:[#allocation0] sm:$0x1] %vm27_vm4, %v26_v11  }
  0x7c   :  { %v32_v12 = vpop.permute.xlu0 %31   ;;  %v38_v13 = vpop.permute.xlu1 %37  }
  0x7d   :  { %34 = vst.msk [vmem:[#allocation0] sm:$0x1] %vm33_vm5, %v32_v12  }
  0x7e   :  { %40 = vst.msk [vmem:[#allocation0] sm:$0x1] %vm39_vm6, %v38_v13  }
  0x80   :  { %v44_v14 = vpop.permute.xlu0 %43  }
  0x81   :  { %46 = vst.msk [vmem:[#allocation0] sm:$0x1] %vm45_vm7, %v44_v14  }
  0x88   :  { %v50_v15 = vld [vmem:[#allocation0] sm:$0x1] }
  0x89   :  { %52 = vst [vmem:[%s112_s1] sm:$0x1] %v50_v15 }

// kernel: basic_block_forward.1
= control target key start
LH: loop header
LB: loop body
LE: loop exit
PB: predicated region body
PF: predicated region fallthrough
CT: control target
= control target key end

     0   :  { %s1034_s18 = smov 0   ;;  %s1240_s0 = inlined_call_operand.vmem [shape: bf16[2,8,128], index: 0, kind: input, shape index: {}]   ;;  %s1241_s1 = inlined_call_operand.vmem [shape: bf16[128,384], index: 1, kind: input, shape index: {}]   ;;  %s1242_s2 = inlined_call_operand.vmem [shape: f32[1,128], index: 2, kind: input, shape index: {}]   ;;  %s1243_s3 = inlined_call_operand.vmem [shape: bf16[128,384], index: 3, kind: input, shape index: {}]   ;;  %s1244_s4 = inlined_call_operand.vmem [shape: f32[1,128], index: 4, kind: input, shape index: {}]   ;;  %s1245_s5 = inlined_call_operand.vmem [shape: f32[2,8,128], index: 5, kind: output, shape index: {}]  }
   0x1 LB: > { %s801_s19 = sadd.s32 4294967295, %s999_s18   ;;  %p805_p0 = scmp.ge.s32.totalorder %s999_s18, 1  ;;  %s999_s18 = sphi %s1034_s18, %s15_s18  }
   0x2   : > { %p186_p1 = scmp.lt.s32.totalorder %s999_s18, 3 }
   0x4   : > { %p187_p2 = pnand %p805_p0, %p186_p1 }
   0x5   : > { %v929_v0 = vld [vmem:[%s1241_s1 + $0x4] ss:$12 sps:$4 sm:$0xff] (!%p187_p2)   ;;  %v1001_v1 = vmov (!%p187_p2), 0.0   ;;  %v931_v2 = vld [vmem:[%s1241_s1 + $0x8] ss:$12 sps:$4 sm:$0xff] (!%p187_p2)   ;;  %vm1002_vm0 = vmmov (!%p187_p2), 0  }
   0x6   : > { %190 = sbr.rel (%p187_p2) target bundleno = 490 (0x1ea), region = 40  ;;  %878 = vmatprep.subr.bf16.mxu1 (!%p187_p2), %v1001_v1  ;;  %894 = vmatprep.mubr.msk.bf16.mxu1 (!%p187_p2), %vm1002_vm0, %v1001_v1  ;;  %v932_v3 = vld [vmem:[%s1241_s1] ss:$12 sps:$4 sm:$0xff] (!%p187_p2)   ;;  %v933_v4 = vld [vmem:[%s1241_s1 + $0x1c] ss:$12 sps:$4 sm:$0xff] (!%p187_p2)   ;;  %v1003_v5 = vmov (!%p187_p2), 0  }
   0x7   : > { %382 = vmatprep.subr.bf16.mxu0 (!%p187_p2), %v929_v0  ;;  %879 = vmatpush3.bf16.msra.mxu1 (!%p187_p2), %v931_v2  ;;  %v935_v6 = vld [vmem:[%s1241_s1 + $0x20] ss:$12 sps:$4 sm:$0xff] (!%p187_p2)   ;;  %v936_v7 = vld [vmem:[%s1241_s1 + $0x18] ss:$12 sps:$4 sm:$0xff] (!%p187_p2)   ;;  %v940_v10 = vld [vmem:[%s1241_s1 + $0x30] ss:$12 sps:$4 sm:$0xff] (!%p187_p2)  }
   0x8   : > { %414 = vmatprep.mubr.bf16.mxu0 (!%p187_p2), %v1003_v5  ;;  %383 = vmatpush1.bf16.msra.mxu0 (!%p187_p2), %v932_v3  ;;  %v937_v8 = vld [vmem:[%s1241_s1 + $0x34] ss:$12 sps:$4 sm:$0xff] (!%p187_p2)   ;;  %v939_v9 = vld [vmem:[%s1241_s1 + $0x38] ss:$12 sps:$4 sm:$0xff] (!%p187_p2)   ;;  %v943_v12 = vld [vmem:[%s1241_s1 + $0x50] ss:$12 sps:$4 sm:$0xff] (!%p187_p2)  }
   0x9   : > { %880 = vmatprep.subr.bf16.mxu1 (!%p187_p2), %v1001_v1  ;;  %384 = vmatprep.subr.bf16.mxu0 (!%p187_p2), %v933_v4  ;;  %v941_v11 = vld [vmem:[%s1241_s1 + $0x4c] ss:$12 sps:$4 sm:$0xff] (!%p187_p2)   ;;  %v944_v13 = vld [vmem:[%s1241_s1 + $0x48] ss:$12 sps:$4 sm:$0xff] (!%p187_p2)   ;;  %v945_v14 = vld [vmem:[%s1241_s1 + $0x64] ss:$12 sps:$4 sm:$0xff] (!%p187_p2)  }
   0xa   : > { %p212_p3 = scmp.lt.s32.totalorder (!%p187_p2), %s801_s19, 1  ;;  %v947_v15 = vld [vmem:[%s1241_s1 + $0x68] ss:$12 sps:$4 sm:$0xff] (!%p187_p2)   ;;  %v948_v16 = vld [vmem:[%s1241_s1 + $0x60] ss:$12 sps:$4 sm:$0xff] (!%p187_p2)   ;;  %vm471_vm1 = vcmask (!%p187_p2), 1046528  }
   0xb   : > { %881 = vmatpush3.bf16.msra.mxu1 (!%p187_p2), %v935_v6  ;;  %v949_v17 = vld [vmem:[%s1241_s1 + $0x7c] ss:$12 sps:$4 sm:$0xff] (!%p187_p2)   ;;  %v951_v18 = vld [vmem:[%s1241_s1 + $0x80] ss:$12 sps:$4 sm:$0xff] (!%p187_p2)   ;;  %v952_v19 = vld [vmem:[%s1241_s1 + $0x78] ss:$12 sps:$4 sm:$0xff] (!%p187_p2)  }
   0xc   : > { %385 = vmatpush1.bf16.msra.mxu0 (!%p187_p2), %v936_v7  ;;  %882 = vmatprep.subr.bf16.mxu1 (!%p187_p2), %v1001_v1  ;;  %v953_v20 = vld [vmem:[%s1241_s1 + $0x94] ss:$12 sps:$4 sm:$0xff] (!%p187_p2)   ;;  %v955_v21 = vld [vmem:[%s1241_s1 + $0x98] ss:$12 sps:$4 sm:$0xff] (!%p187_p2)   ;;  %v956_v22 = vld [vmem:[%s1241_s1 + $0x90] ss:$12 sps:$4 sm:$0xff] (!%p187_p2)  }
   0xd   : > { %386 = vmatprep.subr.bf16.mxu0 %v937_v8  ;;  %s1247_s19 = smov (!%p212_p3, %s801_s19), 1  ;;  %v957_v23 = vld [vmem:[%s1241_s1 + $0xac] ss:$12 sps:$4 sm:$0xff]   ;;  %v959_v24 = vld [vmem:[%s1241_s1 + $0xb0] ss:$12 sps:$4 sm:$0xff]   ;;  %vm466_vm2 = vcmask 1040384  }
   0xe   : > { %s806_s12 = sshll.u32 %s1247_s19, 2  ;;  %v960_v25 = vld [vmem:[%s1241_s1 + $0xa8] ss:$12 sps:$4 sm:$0xff]   ;;  %v963_v27 = vld [vmem:[%s1243_s3 + $0x4] ss:$12 sps:$4 sm:$0xff]   ;;  %s807_s7 = sshll.u32 %s1247_s19, 3 }
   0xf   : > { %883 = vmatpush3.bf16.msra.mxu1 %v939_v9  ;;  %s215_s21 = scalar_lea.vmem %s1240_s0, %s806_s12  ;;  %v964_v28 = vld [vmem:[%s1243_s3 + $0x8] ss:$12 sps:$4 sm:$0xff]   ;;  %v961_v29 = vld [vmem:[%s1243_s3] ss:$12 sps:$4 sm:$0xff]   ;;  %v965_v32 = vld [vmem:[%s1243_s3 + $0x18] ss:$12 sps:$4 sm:$0xff]   ;;  %s219_s10 = scalar_lea.vmem %s1245_s5, %s807_s7 }
  0x10   : > { %387 = vmatpush1.bf16.msra.mxu0 %v940_v10  ;;  %884 = vmatprep.subr.bf16.mxu1 %v1001_v1  ;;  %v1135_v26 = vld [vmem:[%s215_s21] sm:$0xf]  ;;  %v967_v30 = vld [vmem:[%s1243_s3 + $0x1c] ss:$12 sps:$4 sm:$0xff]   ;;  %v972_v34 = vld [vmem:[%s1243_s3 + $0x38] ss:$12 sps:$4 sm:$0xff]  }
  0x11   : > { %388 = vmatprep.subr.bf16.mxu0 %v941_v11  ;;  %v968_v31 = vld [vmem:[%s1243_s3 + $0x20] ss:$12 sps:$4 sm:$0xff]   ;;  %v969_v35 = vld [vmem:[%s1243_s3 + $0x30] ss:$12 sps:$4 sm:$0xff]   ;;  %v973_v38 = vld [vmem:[%s1243_s3 + $0x48] ss:$12 sps:$4 sm:$0xff]  }
  0x12   : > { %v971_v33 = vld [vmem:[%s1243_s3 + $0x34] ss:$12 sps:$4 sm:$0xff]   ;;  %v975_v36 = vld [vmem:[%s1243_s3 + $0x4c] ss:$12 sps:$4 sm:$0xff]   ;;  %v976_v37 = vld [vmem:[%s1243_s3 + $0x50] ss:$12 sps:$4 sm:$0xff]  }
  0x13   : > { %885 = vmatpush3.bf16.msra.mxu1 %v943_v12  ;;  %v979_v39 = vld [vmem:[%s1243_s3 + $0x64] ss:$12 sps:$4 sm:$0xff]   ;;  %v977_v40 = vld [vmem:[%s1243_s3 + $0x60] ss:$12 sps:$4 sm:$0xff]   ;;  %v980_v41 = vld [vmem:[%s1243_s3 + $0x68] ss:$12 sps:$4 sm:$0xff]  }
  0x14   : > { %389 = vmatpush1.bf16.msra.mxu0 %v944_v13  ;;  %886 = vmatprep.subr.bf16.mxu1 %v1001_v1  ;;  %v983_v42 = vld [vmem:[%s1243_s3 + $0x7c] ss:$12 sps:$4 sm:$0xff]   ;;  %v981_v43 = vld [vmem:[%s1243_s3 + $0x78] ss:$12 sps:$4 sm:$0xff]   ;;  %v984_v44 = vld [vmem:[%s1243_s3 + $0x80] ss:$12 sps:$4 sm:$0xff]  }
  0x15   : > { %390 = vmatprep.subr.bf16.mxu0 %v945_v14  ;;  %v987_v45 = vld [vmem:[%s1243_s3 + $0x94] ss:$12 sps:$4 sm:$0xff]   ;;  %v985_v46 = vld [vmem:[%s1243_s3 + $0x90] ss:$12 sps:$4 sm:$0xff]   ;;  %v988_v47 = vld [vmem:[%s1243_s3 + $0x98] ss:$12 sps:$4 sm:$0xff]  }
  0x16   : > { %v991_v48 = vld [vmem:[%s1243_s3 + $0xac] ss:$12 sps:$4 sm:$0xff]   ;;  %v989_v49 = vld [vmem:[%s1243_s3 + $0xa8] ss:$12 sps:$4 sm:$0xff]   ;;  %v992_v50 = vld [vmem:[%s1243_s3 + $0xb0] ss:$12 sps:$4 sm:$0xff]  }
  0x17   : > { %887 = vmatpush3.bf16.msra.mxu1 %v947_v15  ;;  %v832_v0 = vld [vmem:[%s1242_s2] ss:$0 sm:$0xff] }
  0x18   : > { %391 = vmatpush1.bf16.msra.mxu0 %v948_v16  ;;  %888 = vmatprep.subr.bf16.mxu1 %v1001_v1 }
  0x19   : > { %392 = vmatprep.subr.bf16.mxu0 %v949_v17 }
  0x1b   : > { %889 = vmatpush3.bf16.msra.mxu1 %v951_v18  ;;  %v857_v18 = vld [vmem:[%s1244_s4] ss:$0 sm:$0xff] }
  0x1c   : > { %393 = vmatpush1.bf16.msra.mxu0 %v952_v19  ;;  %890 = vmatprep.subr.bf16.mxu1 %v1001_v1  ;;  %v736_v19 = vunpack.c.l.bf16 %v1135_v26 }
  0x1d   : > { %394 = vmatprep.subr.bf16.mxu0 %v953_v20 }
  0x1f   : > { %891 = vmatpush3.bf16.msra.mxu1 %v955_v21 }
  0x20   : > { %395 = vmatpush1.bf16.msra.mxu0 %v956_v22  ;;  %892 = vmatprep.subr.bf16.mxu1 %v1001_v1 }
  0x21   : > { %396 = vmatprep.subr.bf16.mxu0 %v957_v23 }
  0x23   : > { %893 = vmatpush3.bf16.msra.mxu1 %v959_v24 }
  0x24   : > { %397 = vmatpush1.bf16.msra.mxu0 %v960_v25  ;;  %898 = vmatprep.subr.bf16.mxu1 %v1001_v1 }
  0x25   : > { %645 = vmatprep.subr.bf16.mxu0 %v963_v27 }
  0x26   : > { %895 = vmatmul.mubr.bf16.vlgmr.msra.gmra.mrb[0].mxu1 %v1135_v26 }
  0x27   : > { %415 = vmatmul.mubr.bf16.vlgmr.msra.gmra.mrb[0].mxu0 %v1135_v26  ;;  %899 = vmatpush3.bf16.msra.mxu1 %v964_v28 }
  0x28   : > { %646 = vmatpush1.bf16.msra.mxu0 %v961_v29  ;;  %900 = vmatprep.subr.bf16.mxu1 %v1001_v1 }
  0x29   : > { %647 = vmatprep.subr.bf16.mxu0 %v967_v30  ;;  %677 = vmatprep.mubr.bf16.mxu0 %v1003_v5 }
  0x2a   : > { %914 = vmatprep.mubr.msk.bf16.mxu1 %vm1002_vm0, %v1001_v1 }
  0x2b   : > { %901 = vmatpush3.bf16.msra.mxu1 %v968_v31 }
  0x2c   : > { %648 = vmatpush1.bf16.msra.mxu0 %v965_v32  ;;  %902 = vmatprep.subr.bf16.mxu1 %v1001_v1 }
  0x2d   : > { %649 = vmatprep.subr.bf16.mxu0 %v971_v33 }
  0x2f   : > { %903 = vmatpush3.bf16.msra.mxu1 %v972_v34 }
  0x30   : > { %650 = vmatpush1.bf16.msra.mxu0 %v969_v35  ;;  %904 = vmatprep.subr.bf16.mxu1 %v1001_v1 }
  0x31   : > { %651 = vmatprep.subr.bf16.mxu0 %v975_v36 }
  0x33   : > { %905 = vmatpush3.bf16.msra.mxu1 %v976_v37 }
  0x34   : > { %652 = vmatpush1.bf16.msra.mxu0 %v973_v38  ;;  %906 = vmatprep.subr.bf16.mxu1 %v1001_v1 }
  0x35   : > { %653 = vmatprep.subr.bf16.mxu0 %v979_v39 }
  0x37   : > { %907 = vmatpush3.bf16.msra.mxu1 %v980_v41 }
  0x38   : > { %654 = vmatpush1.bf16.msra.mxu0 %v977_v40  ;;  %908 = vmatprep.subr.bf16.mxu1 %v1001_v1 }
  0x39   : > { %655 = vmatprep.subr.bf16.mxu0 %v983_v42 }
  0x3b   : > { %909 = vmatpush3.bf16.msra.mxu1 %v984_v44 }
  0x3c   : > { %656 = vmatpush1.bf16.msra.mxu0 %v981_v43  ;;  %910 = vmatprep.subr.bf16.mxu1 %v1001_v1 }
  0x3d   : > { %657 = vmatprep.subr.bf16.mxu0 %v987_v45 }
  0x3f   : > { %911 = vmatpush3.bf16.msra.mxu1 %v988_v47 }
  0x40   : > { %658 = vmatpush1.bf16.msra.mxu0 %v985_v46  ;;  %912 = vmatprep.subr.bf16.mxu1 %v1001_v1 }
  0x41   : > { %659 = vmatprep.subr.bf16.mxu0 %v991_v48 }
  0x43   : > { %913 = vmatpush3.bf16.msra.mxu1 %v992_v50 }
  0x44   : > { %660 = vmatpush1.bf16.msra.mxu0 %v989_v49 }
  0xf9   : > { %v457_v51 = vpop.f32.mrb[0].mxu1 }
  0xfa   : > { %v469_v52 = vrot.slane %v457_v51, 1  ;;  %v416_v53 = vpop.f32.mrb[0].mxu0  ;;  %v896_v54 = vpop.f32.mrb[1].mxu1 }
  0xfb   : > { %v464_v55 = vrot.slane %v416_v53, 7  ;;  %v418_v56 = vpop.f32.mrb[1].mxu0  ;;  %v460_v57 = vpop.f32.mrb[2].mxu1 }
  0xfc   : > { %v420_v58 = vpop.f32.mrb[2].mxu0  ;;  %v897_v59 = vpop.f32.mrb[3].mxu1  ;;  %v472_v60 = vsel %vm471_vm1, %v469_v52, 0.0 }
  0xfd   : > { %v467_v61 = vsel %vm466_vm2, 0.0, %v464_v55  ;;  %v421_v62 = vpop.f32.mrb[3].mxu0 }
  0xfe   : > { %v473_v63 = vadd.f32 %v467_v61, %v418_v56 }
 0x100   : > { %v474_v1 = vadd.f32 %v473_v63, %v472_v60 }
 0x102   : > { %v482_v2 = vadd.f32 %v832_v0, %v474_v1 }
 0x104   : > { %v483_v3 = vmax.f32 %v482_v2, 0.0 }
 0x106   : > { %v484_v4 = vpack.c.bf16 %v483_v3, %v483_v3 }
 0x108   : > { %678 = vmatmul.mubr.bf16.vlgmr.msra.gmra.mrb[4].mxu0 %v484_v4  ;;  %915 = vmatmul.mubr.bf16.vlgmr.msra.gmra.mrb[4].mxu1 %v484_v4 }
 0x1db   : > { %v679_v5 = vpop.f32.mrb[4].mxu0  ;;  %v720_v6 = vpop.f32.mrb[4].mxu1 }
 0x1dc   : > { %v727_v7 = vrot.slane %v679_v5, 7  ;;  %v731_v8 = vrot.slane %v720_v6, 1  ;;  %v681_v9 = vpop.f32.mrb[5].mxu0  ;;  %v916_v10 = vpop.f32.mrb[5].mxu1 }
 0x1dd   : > { %v683_v11 = vpop.f32.mrb[6].mxu0  ;;  %v723_v12 = vpop.f32.mrb[6].mxu1 }
 0x1de   : > { %v729_v13 = vsel %vm466_vm2, 0.0, %v727_v7  ;;  %v684_v14 = vpop.f32.mrb[7].mxu0  ;;  %v917_v15 = vpop.f32.mrb[7].mxu1  ;;  %v733_v17 = vsel %vm471_vm1, %v731_v8, 0.0 }
 0x1df   : > { %v734_v16 = vadd.f32 %v729_v13, %v681_v9 }
 0x1e1   : > { %v735_v20 = vadd.f32 %v734_v16, %v733_v17 }
 0x1e3   : > { %v744_v21 = vadd.f32 %v857_v18, %v735_v20 }
 0x1e5   : > { %v745_v22 = vadd.f32 %v744_v21, %v736_v19 }
 0x1e7   : > { %v746_v23 = vmax.f32 %v745_v22, 0.0 }
 0x1e9   : > { %747 = vst [vmem:[%s219_s10] sm:$0xff] %v746_v23 }
 0x1ea PF: > { %s15_s18 = sadd.s32 1, %s999_s18  }
 0x1eb   : > { %p12_p4 = scmp.ge.s32.totalorder %s15_s18, 4  }
 0x1ed   :  { %14 = sbr.rel (!%p12_p4) target bundleno = 1 (0x1), region = 70 }

</bundles_post_ra>
